<compile_context>
chip_gen: v6e
topology: v6e:2x2x1
jax: 0.10.0
libtpu: 0.0.40
codegen_flags: <defaults>
</compile_context>

<pallas_src>
import functools

import jax
import jax.numpy as jnp
from jax import lax
from jax.experimental import pallas as pl
from jax.experimental.pallas import tpu as pltpu

# Demo sizes (kept small; the wrapper handles arbitrary S / N).
NUM_LOCS = 200      # candidate location vocabulary held by query_sys
SEQ_LEN = 12        # len(trg_seq)
NUM_NEAREST = 8     # self.num_nearest
K_NEG = 4           # k negative samples per check-in

LANE = 128
SUBLANE = 8
S_TILE_MAX = 256    # rows of trg_seq per grid step (amortizes per-step overhead)
N_CHUNK_MAX = 512   # candidate columns per grid step (bounds VMEM on v7x)
PAD_COORD = 1e9     # padding coordinate -> huge (finite) distance -> never selected
_INT32_MAX = 2 ** 31 - 1


def _round_up(x, m):
    return (x + m - 1) // m * m


def _choose_s_tile(s):
    """Sequence tile: >= 2 grid steps (v7x has 2 TensorCores) once there is enough
    work, capped at S_TILE_MAX rows per step to bound per-step VMEM."""
    s8 = _round_up(max(int(s), 1), SUBLANE)
    if s8 <= SUBLANE:
        return SUBLANE
    return int(min(S_TILE_MAX, _round_up((s8 + 1) // 2, SUBLANE)))


def _candidate_layout(n, max_n_chunk=N_CHUNK_MAX):
    """Candidate-table chunking and the packed-key column-id mask."""
    n_chunk = int(min(max_n_chunk, _round_up(int(n), LANE)))
    n_pad = int(_round_up(int(n), n_chunk))
    idx_mask = pl.next_power_of_2(n_pad) - 1
    return n_chunk, n_pad, idx_mask


def _knn_sampler_kernel(coords_ref, cand_ref, ridx_ref, neg_ref, best_ref, *,
                        idx_mask):
    """One (sequence-tile, candidate-chunk) grid step.

    coords_ref : [S, 2]            f32  target (lat, lon) per check-in
    cand_ref   : [2, Nc]           f32  current chunk of the candidate table
    ridx_ref   : [S, k]            i32  uniform slot indices in [0, num_nearest)
    neg_ref    : [S, k]            i32  sampled neighbour ids (written on last chunk)
    best_ref   : [S, num_nearest]  i32  scratch: running top-k packed keys
    """
    ci = pl.program_id(1)
    last_chunk = pl.num_programs(1) - 1
    S = coords_ref.shape[0]
    n_chunk = cand_ref.shape[1]
    num_nearest = best_ref.shape[1]
    k = neg_ref.shape[1]
    keep_mask = jnp.int32(~idx_mask)
    id_mask = jnp.int32(idx_mask)
    int32_max = jnp.int32(_INT32_MAX)

    # New sequence tile (chunk axis restarting): reset the running top-k.
    @pl.when(ci == 0)
    def _():
        best_ref[...] = jnp.full((S, num_nearest), int32_max, jnp.int32)

    # Squared euclidean distance, elementwise on the VPU (contraction dim is 2:
    # deliberately NOT an MXU matmul).
    t_lat = coords_ref[:, 0:1]                          # [S, 1]
    t_lon = coords_ref[:, 1:2]                          # [S, 1]
    c = cand_ref[...]                                   # [2, Nc]
    d_lat = t_lat - c[0:1, :]
    d_lon = t_lon - c[1:2, :]
    dist = d_lat * d_lat + d_lon * d_lon                # [S, Nc], >= 0, finite

    # dist >= 0  =>  bitcast(dist) is order-preserving int32.  Pack
    # (truncated distance | global column id) into one key so each top-k step
    # needs a single cross-lane min per array instead of min + argmin.
    col_ids = lax.broadcasted_iota(jnp.int32, (S, n_chunk), 1) + ci * n_chunk
    chunk_key = jnp.bitwise_or(
        jnp.bitwise_and(lax.bitcast_convert_type(dist, jnp.int32), keep_mask),
        col_ids)

    prev_key = best_ref[...]                            # top-k of earlier chunks
    slot_ids = lax.broadcasted_iota(jnp.int32, (S, num_nearest), 1)
    new_best = jnp.full((S, num_nearest), int32_max, jnp.int32)

    # Sampling fused into the selection loop.  ridx holds uniform-with-replacement
    # slot choices; every element of `neg` is rewritten during the last chunk,
    # where the extraction order is the final global KNN order.
    ridx = ridx_ref[...]                                # [S, k]
    neg = jnp.zeros((S, k), jnp.int32)

    # query_sys.get_knn: streaming top-num_nearest extraction, merging the current
    # chunk with the running best of all previous chunks.
    for m in range(num_nearest):
        best = jnp.minimum(jnp.min(chunk_key, axis=1, keepdims=True),
                           jnp.min(prev_key, axis=1, keepdims=True))   # [S, 1]
        new_best = jnp.where(slot_ids == m, best, new_best)
        neg = jnp.where(ridx == m, jnp.bitwise_and(best, id_mask), neg)
        # Keys are unique (column id in the low bits) -> exact equality removes
        # the winner; no separate col_ids == argmin compare needed.
        chunk_key = jnp.where(chunk_key == best, int32_max, chunk_key)
        prev_key = jnp.where(prev_key == best, int32_max, prev_key)

    best_ref[...] = new_best                            # single full-width store

    @pl.when(ci == last_chunk)
    def _():
        neg_ref[...] = neg


def knn_sampler(trg_seq, k, user, loc_coords, seed,
                num_nearest=NUM_NEAREST, exclude_visited=False,
                max_n_chunk=N_CHUNK_MAX):
    """JAX/Pallas equivalent of KNNSampler.forward(trg_seq, k, user)."""
    del user
    # TODO(synk): exclude_visited=True (data-dependent rejection resampling against
    # user_visited_locs) has no clean Pallas equivalent; only the default
    # exclude_visited=False branch is implemented.
    assert not exclude_visited
    S = int(trg_seq.shape[0])
    N = int(loc_coords.shape[0])
    assert num_nearest <= N

    n_chunk, n_pad, idx_mask = _candidate_layout(N, max_n_chunk)
    s_tile = _choose_s_tile(S)
    s_pad = _round_up(S, s_tile)
    num_s_tiles = s_pad // s_tile
    num_n_chunks = n_pad // n_chunk

    # check_in[1] == target loc id; gather its coordinates (tiny XLA glue op).
    trg_coords = loc_coords[trg_seq[:, 1]].astype(jnp.float32)       # [S, 2]
    # Candidate table, lane-dense [2, N]; pad columns with a huge coordinate so
    # they can never enter the top-k.
    cand = loc_coords.astype(jnp.float32).T                          # [2, N]
    if n_pad != N:
        cand = jnp.pad(cand, ((0, 0), (0, n_pad - N)), constant_values=PAD_COORD)

    # np.random.choice(nearby_locs, size=k, replace=True) analogue: seeded
    # uniform-with-replacement slot indices, drawn once in the wrapper.
    ridx = jax.random.randint(jax.random.PRNGKey(seed), (S, k), 0, num_nearest,
                              dtype=jnp.int32)

    if s_pad != S:
        trg_coords = jnp.pad(trg_coords, ((0, s_pad - S), (0, 0)))
        ridx = jnp.pad(ridx, ((0, s_pad - S), (0, 0)))

    kernel = functools.partial(_knn_sampler_kernel, idx_mask=idx_mask)

    neg = pl.pallas_call(
        kernel,
        out_shape=jax.ShapeDtypeStruct((s_pad, k), jnp.int32),
        grid=(num_s_tiles, num_n_chunks),
        in_specs=[
            pl.BlockSpec((s_tile, 2), lambda si, ci: (si, 0)),       # target coords
            pl.BlockSpec((2, n_chunk), lambda si, ci: (0, ci)),      # candidate chunk
            pl.BlockSpec((s_tile, k), lambda si, ci: (si, 0)),       # random slots
        ],
        out_specs=pl.BlockSpec((s_tile, k), lambda si, ci: (si, 0)),
        scratch_shapes=[pltpu.VMEM((s_tile, num_nearest), jnp.int32)],
        compiler_params=pltpu.CompilerParams(
            # Sequence tiles are independent (megacore sharding on v7x); the
            # candidate-chunk axis is a running top-k reduction -> sequential.
            dimension_semantics=("parallel", "arbitrary"),
            vmem_limit_bytes=32 * 1024 * 1024),
    )(trg_coords, cand, ridx)

    neg = neg[:S]
    # probs is a constant; not worth a kernel output DMA / masked narrow store.
    probs = jnp.ones((S, k), jnp.float32)
    # TODO(synk): torch.long is int64; without jax x64 the ids stay int32 (values identical).
    return neg, probs


def knn_sampler_reference(trg_seq, k, loc_coords, seed,
                          num_nearest=NUM_NEAREST, max_n_chunk=N_CHUNK_MAX):
    """Pure-JAX reference using the same packed-key ordering (exact-match check)."""
    _, _, idx_mask = _candidate_layout(loc_coords.shape[0], max_n_chunk)
    tc = loc_coords[trg_seq[:, 1]].astype(jnp.float32)               # [S, 2]
    cc = loc_coords.astype(jnp.float32).T                            # [2, N]
    d_lat = tc[:, 0:1] - cc[0:1, :]
    d_lon = tc[:, 1:2] - cc[1:2, :]
    dist = d_lat * d_lat + d_lon * d_lon                             # [S, N]
    col = jnp.arange(loc_coords.shape[0], dtype=jnp.int32)[None, :]
    key = jnp.bitwise_or(
        jnp.bitwise_and(lax.bitcast_convert_type(dist, jnp.int32),
                        jnp.int32(~idx_mask)),
        col)
    # Keys are unique per column, so iterative min extraction == ascending sort.
    nearby = jnp.bitwise_and(jnp.sort(key, axis=1)[:, :num_nearest],
                             jnp.int32(idx_mask))                    # [S, num_nearest]
    ridx = jax.random.randint(jax.random.PRNGKey(seed),
                              (trg_seq.shape[0], k), 0, num_nearest,
                              dtype=jnp.int32)
    neg = jnp.take_along_axis(nearby, ridx, axis=1)
    return neg, jnp.ones_like(neg, jnp.float32)


if __name__ == "__main__":
    key = jax.random.PRNGKey(0)
    k_coords, k_locs = jax.random.split(key)

    # Deterministic "query system" coordinate table (module __init__ state analogue).
    loc_coords = jax.random.uniform(k_coords, (NUM_LOCS, 2), dtype=jnp.float32)

    # trg_seq: [S, 3] int32 check-ins (user, loc, time); check_in[1] is the target loc.
    locs = jax.random.randint(k_locs, (SEQ_LEN,), 0, NUM_LOCS, dtype=jnp.int32)
    trg_seq = jnp.stack(
        [jnp.zeros_like(locs), locs, jnp.arange(SEQ_LEN, dtype=jnp.int32)], axis=1)

    seed = 42
    # (a) single candidate chunk (N <= N_CHUNK_MAX); (b) forced multi-chunk path
    # to also exercise the streaming top-k merge across candidate chunks.
    for max_n_chunk in (N_CHUNK_MAX, LANE):
        neg_samples, probs = knn_sampler(trg_seq, k=K_NEG, user=0,
                                         loc_coords=loc_coords, seed=seed,
                                         max_n_chunk=max_n_chunk)
        jax.block_until_ready((neg_samples, probs))

        exp_neg, exp_probs = knn_sampler_reference(trg_seq, K_NEG, loc_coords, seed,
                                                   max_n_chunk=max_n_chunk)
        assert neg_samples.shape == (SEQ_LEN, K_NEG) and neg_samples.dtype == jnp.int32
        assert probs.shape == (SEQ_LEN, K_NEG) and probs.dtype == jnp.float32
        assert bool(jnp.all(neg_samples == exp_neg)), (
            f"kernel != reference KNN sampling (max_n_chunk={max_n_chunk})")
        assert bool(jnp.all(probs == 1.0))

    print("KERNEL_OK")
</pallas_src>

<mosaic_0001>
module attributes {stable_mosaic.version = 11 : i64} {
  func.func @_knn_sampler_kernel(%arg0: i32, %arg1: i32, %arg2: memref<8x2xf32, #tpu.memory_space<vmem>>, %arg3: memref<2x256xf32, #tpu.memory_space<vmem>>, %arg4: memref<8x4xi32, #tpu.memory_space<vmem>>, %arg5: memref<8x4xi32, #tpu.memory_space<vmem>>, %arg6: memref<8x8xi32, #tpu.memory_space<vmem>>) attributes {dimension_semantics = [#tpu.dimension_semantics<parallel>, #tpu.dimension_semantics<arbitrary>], iteration_bounds = array<i64: 2, 1>, scalar_prefetch = 0 : i64, scratch_operands = 1 : i64, tpu.core_type = #tpu.core_type<tc>, window_params = [{transform_indices = @transform_0, window_bounds = array<i64: 8, 2>}, {transform_indices = @transform_1, window_bounds = array<i64: 2, 256>}, {transform_indices = @transform_2, window_bounds = array<i64: 8, 4>}, {transform_indices = @transform_3, window_bounds = array<i64: 8, 4>}]} {
    %c0_i32 = arith.constant 0 : i32
    %0 = arith.cmpi eq, %arg1, %c0_i32 : i32
    %1 = arith.extui %0 : i1 to i32
    %c2147483647_i32 = arith.constant 2147483647 : i32
    %c0_i32_0 = arith.constant 0 : i32
    %2 = arith.cmpi ne, %1, %c0_i32_0 : i32
    scf.if %2 {
      %226 = vector.broadcast %c2147483647_i32 : i32 to vector<8x8xi32>
      %c0_60 = arith.constant 0 : index
      %c0_61 = arith.constant 0 : index
      %227 = vector.load %arg6[%c0_60, %c0_61] : memref<8x8xi32, #tpu.memory_space<vmem>>, vector<8x8xi32>
      tpu.vector_store %arg6[%c0_60, %c0_61], %226 {strides = array<i32>} : memref<8x8xi32, #tpu.memory_space<vmem>>, vector<8x8xi32>,
    } else {
    }
    %c0 = arith.constant 0 : index
    %c0_1 = arith.constant 0 : index
    %3 = vector.load %arg2[%c0, %c0_1] : memref<8x2xf32, #tpu.memory_space<vmem>>, vector<8x1xf32>
    %c0_2 = arith.constant 0 : index
    %c1 = arith.constant 1 : index
    %4 = vector.load %arg2[%c0_2, %c1] : memref<8x2xf32, #tpu.memory_space<vmem>>, vector<8x1xf32>
    %c0_3 = arith.constant 0 : index
    %c0_4 = arith.constant 0 : index
    %5 = vector.load %arg3[%c0_3, %c0_4] : memref<2x256xf32, #tpu.memory_space<vmem>>, vector<2x256xf32>
    %6 = vector.extract_strided_slice %5 {offsets = [0, 0], sizes = [1, 256], strides = [1, 1]} : vector<2x256xf32> to vector<1x256xf32>
    %7 = vector.broadcast %3 : vector<8x1xf32> to vector<8x256xf32>
    %8 = vector.broadcast %6 : vector<1x256xf32> to vector<8x256xf32>
    %9 = arith.subf %7, %8 : vector<8x256xf32>
    %10 = vector.extract_strided_slice %5 {offsets = [1, 0], sizes = [1, 256], strides = [1, 1]} : vector<2x256xf32> to vector<1x256xf32>
    %11 = vector.broadcast %4 : vector<8x1xf32> to vector<8x256xf32>
    %12 = vector.broadcast %10 : vector<1x256xf32> to vector<8x256xf32>
    %13 = arith.subf %11, %12 : vector<8x256xf32>
    %14 = arith.mulf %9, %9 : vector<8x256xf32>
    %15 = arith.mulf %13, %13 : vector<8x256xf32>
    %16 = arith.addf %14, %15 : vector<8x256xf32>
    %17 = tpu.iota {dimensions = array<i32: 1>} : vector<8x256xi32>
    %c256_i32 = arith.constant 256 : i32
    %18 = arith.muli %arg1, %c256_i32 : i32
    %19 = vector.broadcast %18 : i32 to vector<8x256xi32>
    %20 = arith.addi %17, %19 : vector<8x256xi32>
    %21 = tpu.bitcast %16 : vector<8x256xf32> -> vector<8x256xi32>
    %c-256_i32 = arith.constant -256 : i32
    %22 = vector.broadcast %c-256_i32 : i32 to vector<8x256xi32>
    %23 = arith.andi %21, %22 : vector<8x256xi32>
    %24 = arith.ori %23, %20 : vector<8x256xi32>
    %c0_5 = arith.constant 0 : index
    %c0_6 = arith.constant 0 : index
    %25 = vector.load %arg6[%c0_5, %c0_6] : memref<8x8xi32, #tpu.memory_space<vmem>>, vector<8x8xi32>
    %26 = tpu.iota {dimensions = array<i32: 1>} : vector<8x8xi32>
    %c2147483647_i32_7 = arith.constant 2147483647 : i32
    %27 = vector.broadcast %c2147483647_i32_7 : i32 to vector<8x8xi32>
    %c0_8 = arith.constant 0 : index
    %c0_9 = arith.constant 0 : index
    %28 = vector.load %arg4[%c0_8, %c0_9] : memref<8x4xi32, #tpu.memory_space<vmem>>, vector<8x4xi32>
    %c0_i32_10 = arith.constant 0 : i32
    %29 = vector.broadcast %c0_i32_10 : i32 to vector<8x4xi32>
    %cst = arith.constant dense<2147483647> : vector<8xi32>
    %30 = vector.multi_reduction <minsi>, %24, %cst [1] : vector<8x256xi32> to vector<8xi32>
    %31 = vector.shape_cast %30 : vector<8xi32> to vector<8x1xi32>
    %cst_11 = arith.constant dense<2147483647> : vector<8xi32>
    %32 = vector.multi_reduction <minsi>, %25, %cst_11 [1] : vector<8x8xi32> to vector<8xi32>
    %33 = vector.shape_cast %32 : vector<8xi32> to vector<8x1xi32>
    %34 = arith.minsi %31, %33 : vector<8x1xi32>
    %c0_i32_12 = arith.constant 0 : i32
    %35 = vector.broadcast %c0_i32_12 : i32 to vector<8x8xi32>
    %36 = arith.cmpi eq, %26, %35 : vector<8x8xi32>
    %37 = vector.shape_cast %34 : vector<8x1xi32> to vector<8x1xi32>
    %38 = vector.broadcast %37 : vector<8x1xi32> to vector<8x8xi32>
    %39 = arith.select %36, %38, %27 : vector<8x8xi1>, vector<8x8xi32>
    %c0_i32_13 = arith.constant 0 : i32
    %40 = vector.broadcast %c0_i32_13 : i32 to vector<8x4xi32>
    %41 = arith.cmpi eq, %28, %40 : vector<8x4xi32>
    %c255_i32 = arith.constant 255 : i32
    %42 = vector.broadcast %c255_i32 : i32 to vector<8x1xi32>
    %43 = arith.andi %34, %42 : vector<8x1xi32>
    %44 = vector.shape_cast %43 : vector<8x1xi32> to vector<8x1xi32>
    %45 = vector.broadcast %44 : vector<8x1xi32> to vector<8x4xi32>
    %46 = arith.select %41, %45, %29 : vector<8x4xi1>, vector<8x4xi32>
    %47 = vector.broadcast %34 : vector<8x1xi32> to vector<8x256xi32>
    %48 = arith.cmpi eq, %24, %47 : vector<8x256xi32>
    %c2147483647_i32_14 = arith.constant 2147483647 : i32
    %49 = vector.broadcast %c2147483647_i32_14 : i32 to vector<8x256xi32>
    %50 = arith.select %48, %49, %24 : vector<8x256xi1>, vector<8x256xi32>
    %51 = vector.broadcast %34 : vector<8x1xi32> to vector<8x8xi32>
    %52 = arith.cmpi eq, %25, %51 : vector<8x8xi32>
    %c2147483647_i32_15 = arith.constant 2147483647 : i32
    %53 = vector.broadcast %c2147483647_i32_15 : i32 to vector<8x8xi32>
    %54 = arith.select %52, %53, %25 : vector<8x8xi1>, vector<8x8xi32>
    %cst_16 = arith.constant dense<2147483647> : vector<8xi32>
    %55 = vector.multi_reduction <minsi>, %50, %cst_16 [1] : vector<8x256xi32> to vector<8xi32>
    %56 = vector.shape_cast %55 : vector<8xi32> to vector<8x1xi32>
    %cst_17 = arith.constant dense<2147483647> : vector<8xi32>
    %57 = vector.multi_reduction <minsi>, %54, %cst_17 [1] : vector<8x8xi32> to vector<8xi32>
    %58 = vector.shape_cast %57 : vector<8xi32> to vector<8x1xi32>
    %59 = arith.minsi %56, %58 : vector<8x1xi32>
    %c1_i32 = arith.constant 1 : i32
    %60 = vector.broadcast %c1_i32 : i32 to vector<8x8xi32>
    %61 = arith.cmpi eq, %26, %60 : vector<8x8xi32>
    %62 = vector.shape_cast %59 : vector<8x1xi32> to vector<8x1xi32>
    %63 = vector.broadcast %62 : vector<8x1xi32> to vector<8x8xi32>
    %64 = arith.select %61, %63, %39 : vector<8x8xi1>, vector<8x8xi32>
    %c1_i32_18 = arith.constant 1 : i32
    %65 = vector.broadcast %c1_i32_18 : i32 to vector<8x4xi32>
    %66 = arith.cmpi eq, %28, %65 : vector<8x4xi32>
    %c255_i32_19 = arith.constant 255 : i32
    %67 = vector.broadcast %c255_i32_19 : i32 to vector<8x1xi32>
    %68 = arith.andi %59, %67 : vector<8x1xi32>
    %69 = vector.shape_cast %68 : vector<8x1xi32> to vector<8x1xi32>
    %70 = vector.broadcast %69 : vector<8x1xi32> to vector<8x4xi32>
    %71 = arith.select %66, %70, %46 : vector<8x4xi1>, vector<8x4xi32>
    %72 = vector.broadcast %59 : vector<8x1xi32> to vector<8x256xi32>
    %73 = arith.cmpi eq, %50, %72 : vector<8x256xi32>
    %c2147483647_i32_20 = arith.constant 2147483647 : i32
    %74 = vector.broadcast %c2147483647_i32_20 : i32 to vector<8x256xi32>
    %75 = arith.select %73, %74, %50 : vector<8x256xi1>, vector<8x256xi32>
    %76 = vector.broadcast %59 : vector<8x1xi32> to vector<8x8xi32>
    %77 = arith.cmpi eq, %54, %76 : vector<8x8xi32>
    %c2147483647_i32_21 = arith.constant 2147483647 : i32
    %78 = vector.broadcast %c2147483647_i32_21 : i32 to vector<8x8xi32>
    %79 = arith.select %77, %78, %54 : vector<8x8xi1>, vector<8x8xi32>
    %cst_22 = arith.constant dense<2147483647> : vector<8xi32>
    %80 = vector.multi_reduction <minsi>, %75, %cst_22 [1] : vector<8x256xi32> to vector<8xi32>
    %81 = vector.shape_cast %80 : vector<8xi32> to vector<8x1xi32>
    %cst_23 = arith.constant dense<2147483647> : vector<8xi32>
    %82 = vector.multi_reduction <minsi>, %79, %cst_23 [1] : vector<8x8xi32> to vector<8xi32>
    %83 = vector.shape_cast %82 : vector<8xi32> to vector<8x1xi32>
    %84 = arith.minsi %81, %83 : vector<8x1xi32>
    %c2_i32 = arith.constant 2 : i32
    %85 = vector.broadcast %c2_i32 : i32 to vector<8x8xi32>
    %86 = arith.cmpi eq, %26, %85 : vector<8x8xi32>
    %87 = vector.shape_cast %84 : vector<8x1xi32> to vector<8x1xi32>
    %88 = vector.broadcast %87 : vector<8x1xi32> to vector<8x8xi32>
    %89 = arith.select %86, %88, %64 : vector<8x8xi1>, vector<8x8xi32>
    %c2_i32_24 = arith.constant 2 : i32
    %90 = vector.broadcast %c2_i32_24 : i32 to vector<8x4xi32>
    %91 = arith.cmpi eq, %28, %90 : vector<8x4xi32>
    %c255_i32_25 = arith.constant 255 : i32
    %92 = vector.broadcast %c255_i32_25 : i32 to vector<8x1xi32>
    %93 = arith.andi %84, %92 : vector<8x1xi32>
    %94 = vector.shape_cast %93 : vector<8x1xi32> to vector<8x1xi32>
    %95 = vector.broadcast %94 : vector<8x1xi32> to vector<8x4xi32>
    %96 = arith.select %91, %95, %71 : vector<8x4xi1>, vector<8x4xi32>
    %97 = vector.broadcast %84 : vector<8x1xi32> to vector<8x256xi32>
    %98 = arith.cmpi eq, %75, %97 : vector<8x256xi32>
    %c2147483647_i32_26 = arith.constant 2147483647 : i32
    %99 = vector.broadcast %c2147483647_i32_26 : i32 to vector<8x256xi32>
    %100 = arith.select %98, %99, %75 : vector<8x256xi1>, vector<8x256xi32>
    %101 = vector.broadcast %84 : vector<8x1xi32> to vector<8x8xi32>
    %102 = arith.cmpi eq, %79, %101 : vector<8x8xi32>
    %c2147483647_i32_27 = arith.constant 2147483647 : i32
    %103 = vector.broadcast %c2147483647_i32_27 : i32 to vector<8x8xi32>
    %104 = arith.select %102, %103, %79 : vector<8x8xi1>, vector<8x8xi32>
    %cst_28 = arith.constant dense<2147483647> : vector<8xi32>
    %105 = vector.multi_reduction <minsi>, %100, %cst_28 [1] : vector<8x256xi32> to vector<8xi32>
    %106 = vector.shape_cast %105 : vector<8xi32> to vector<8x1xi32>
    %cst_29 = arith.constant dense<2147483647> : vector<8xi32>
    %107 = vector.multi_reduction <minsi>, %104, %cst_29 [1] : vector<8x8xi32> to vector<8xi32>
    %108 = vector.shape_cast %107 : vector<8xi32> to vector<8x1xi32>
    %109 = arith.minsi %106, %108 : vector<8x1xi32>
    %c3_i32 = arith.constant 3 : i32
    %110 = vector.broadcast %c3_i32 : i32 to vector<8x8xi32>
    %111 = arith.cmpi eq, %26, %110 : vector<8x8xi32>
    %112 = vector.shape_cast %109 : vector<8x1xi32> to vector<8x1xi32>
    %113 = vector.broadcast %112 : vector<8x1xi32> to vector<8x8xi32>
    %114 = arith.select %111, %113, %89 : vector<8x8xi1>, vector<8x8xi32>
    %c3_i32_30 = arith.constant 3 : i32
    %115 = vector.broadcast %c3_i32_30 : i32 to vector<8x4xi32>
    %116 = arith.cmpi eq, %28, %115 : vector<8x4xi32>
    %c255_i32_31 = arith.constant 255 : i32
    %117 = vector.broadcast %c255_i32_31 : i32 to vector<8x1xi32>
    %118 = arith.andi %109, %117 : vector<8x1xi32>
    %119 = vector.shape_cast %118 : vector<8x1xi32> to vector<8x1xi32>
    %120 = vector.broadcast %119 : vector<8x1xi32> to vector<8x4xi32>
    %121 = arith.select %116, %120, %96 : vector<8x4xi1>, vector<8x4xi32>
    %122 = vector.broadcast %109 : vector<8x1xi32> to vector<8x256xi32>
    %123 = arith.cmpi eq, %100, %122 : vector<8x256xi32>
    %c2147483647_i32_32 = arith.constant 2147483647 : i32
    %124 = vector.broadcast %c2147483647_i32_32 : i32 to vector<8x256xi32>
    %125 = arith.select %123, %124, %100 : vector<8x256xi1>, vector<8x256xi32>
    %126 = vector.broadcast %109 : vector<8x1xi32> to vector<8x8xi32>
    %127 = arith.cmpi eq, %104, %126 : vector<8x8xi32>
    %c2147483647_i32_33 = arith.constant 2147483647 : i32
    %128 = vector.broadcast %c2147483647_i32_33 : i32 to vector<8x8xi32>
    %129 = arith.select %127, %128, %104 : vector<8x8xi1>, vector<8x8xi32>
    %cst_34 = arith.constant dense<2147483647> : vector<8xi32>
    %130 = vector.multi_reduction <minsi>, %125, %cst_34 [1] : vector<8x256xi32> to vector<8xi32>
    %131 = vector.shape_cast %130 : vector<8xi32> to vector<8x1xi32>
    %cst_35 = arith.constant dense<2147483647> : vector<8xi32>
    %132 = vector.multi_reduction <minsi>, %129, %cst_35 [1] : vector<8x8xi32> to vector<8xi32>
    %133 = vector.shape_cast %132 : vector<8xi32> to vector<8x1xi32>
    %134 = arith.minsi %131, %133 : vector<8x1xi32>
    %c4_i32 = arith.constant 4 : i32
    %135 = vector.broadcast %c4_i32 : i32 to vector<8x8xi32>
    %136 = arith.cmpi eq, %26, %135 : vector<8x8xi32>
    %137 = vector.shape_cast %134 : vector<8x1xi32> to vector<8x1xi32>
    %138 = vector.broadcast %137 : vector<8x1xi32> to vector<8x8xi32>
    %139 = arith.select %136, %138, %114 : vector<8x8xi1>, vector<8x8xi32>
    %c4_i32_36 = arith.constant 4 : i32
    %140 = vector.broadcast %c4_i32_36 : i32 to vector<8x4xi32>
    %141 = arith.cmpi eq, %28, %140 : vector<8x4xi32>
    %c255_i32_37 = arith.constant 255 : i32
    %142 = vector.broadcast %c255_i32_37 : i32 to vector<8x1xi32>
    %143 = arith.andi %134, %142 : vector<8x1xi32>
    %144 = vector.shape_cast %143 : vector<8x1xi32> to vector<8x1xi32>
    %145 = vector.broadcast %144 : vector<8x1xi32> to vector<8x4xi32>
    %146 = arith.select %141, %145, %121 : vector<8x4xi1>, vector<8x4xi32>
    %147 = vector.broadcast %134 : vector<8x1xi32> to vector<8x256xi32>
    %148 = arith.cmpi eq, %125, %147 : vector<8x256xi32>
    %c2147483647_i32_38 = arith.constant 2147483647 : i32
    %149 = vector.broadcast %c2147483647_i32_38 : i32 to vector<8x256xi32>
    %150 = arith.select %148, %149, %125 : vector<8x256xi1>, vector<8x256xi32>
    %151 = vector.broadcast %134 : vector<8x1xi32> to vector<8x8xi32>
    %152 = arith.cmpi eq, %129, %151 : vector<8x8xi32>
    %c2147483647_i32_39 = arith.constant 2147483647 : i32
    %153 = vector.broadcast %c2147483647_i32_39 : i32 to vector<8x8xi32>
    %154 = arith.select %152, %153, %129 : vector<8x8xi1>, vector<8x8xi32>
    %cst_40 = arith.constant dense<2147483647> : vector<8xi32>
    %155 = vector.multi_reduction <minsi>, %150, %cst_40 [1] : vector<8x256xi32> to vector<8xi32>
    %156 = vector.shape_cast %155 : vector<8xi32> to vector<8x1xi32>
    %cst_41 = arith.constant dense<2147483647> : vector<8xi32>
    %157 = vector.multi_reduction <minsi>, %154, %cst_41 [1] : vector<8x8xi32> to vector<8xi32>
    %158 = vector.shape_cast %157 : vector<8xi32> to vector<8x1xi32>
    %159 = arith.minsi %156, %158 : vector<8x1xi32>
    %c5_i32 = arith.constant 5 : i32
    %160 = vector.broadcast %c5_i32 : i32 to vector<8x8xi32>
    %161 = arith.cmpi eq, %26, %160 : vector<8x8xi32>
    %162 = vector.shape_cast %159 : vector<8x1xi32> to vector<8x1xi32>
    %163 = vector.broadcast %162 : vector<8x1xi32> to vector<8x8xi32>
    %164 = arith.select %161, %163, %139 : vector<8x8xi1>, vector<8x8xi32>
    %c5_i32_42 = arith.constant 5 : i32
    %165 = vector.broadcast %c5_i32_42 : i32 to vector<8x4xi32>
    %166 = arith.cmpi eq, %28, %165 : vector<8x4xi32>
    %c255_i32_43 = arith.constant 255 : i32
    %167 = vector.broadcast %c255_i32_43 : i32 to vector<8x1xi32>
    %168 = arith.andi %159, %167 : vector<8x1xi32>
    %169 = vector.shape_cast %168 : vector<8x1xi32> to vector<8x1xi32>
    %170 = vector.broadcast %169 : vector<8x1xi32> to vector<8x4xi32>
    %171 = arith.select %166, %170, %146 : vector<8x4xi1>, vector<8x4xi32>
    %172 = vector.broadcast %159 : vector<8x1xi32> to vector<8x256xi32>
    %173 = arith.cmpi eq, %150, %172 : vector<8x256xi32>
    %c2147483647_i32_44 = arith.constant 2147483647 : i32
    %174 = vector.broadcast %c2147483647_i32_44 : i32 to vector<8x256xi32>
    %175 = arith.select %173, %174, %150 : vector<8x256xi1>, vector<8x256xi32>
    %176 = vector.broadcast %159 : vector<8x1xi32> to vector<8x8xi32>
    %177 = arith.cmpi eq, %154, %176 : vector<8x8xi32>
    %c2147483647_i32_45 = arith.constant 2147483647 : i32
    %178 = vector.broadcast %c2147483647_i32_45 : i32 to vector<8x8xi32>
    %179 = arith.select %177, %178, %154 : vector<8x8xi1>, vector<8x8xi32>
    %cst_46 = arith.constant dense<2147483647> : vector<8xi32>
    %180 = vector.multi_reduction <minsi>, %175, %cst_46 [1] : vector<8x256xi32> to vector<8xi32>
    %181 = vector.shape_cast %180 : vector<8xi32> to vector<8x1xi32>
    %cst_47 = arith.constant dense<2147483647> : vector<8xi32>
    %182 = vector.multi_reduction <minsi>, %179, %cst_47 [1] : vector<8x8xi32> to vector<8xi32>
    %183 = vector.shape_cast %182 : vector<8xi32> to vector<8x1xi32>
    %184 = arith.minsi %181, %183 : vector<8x1xi32>
    %c6_i32 = arith.constant 6 : i32
    %185 = vector.broadcast %c6_i32 : i32 to vector<8x8xi32>
    %186 = arith.cmpi eq, %26, %185 : vector<8x8xi32>
    %187 = vector.shape_cast %184 : vector<8x1xi32> to vector<8x1xi32>
    %188 = vector.broadcast %187 : vector<8x1xi32> to vector<8x8xi32>
    %189 = arith.select %186, %188, %164 : vector<8x8xi1>, vector<8x8xi32>
    %c6_i32_48 = arith.constant 6 : i32
    %190 = vector.broadcast %c6_i32_48 : i32 to vector<8x4xi32>
    %191 = arith.cmpi eq, %28, %190 : vector<8x4xi32>
    %c255_i32_49 = arith.constant 255 : i32
    %192 = vector.broadcast %c255_i32_49 : i32 to vector<8x1xi32>
    %193 = arith.andi %184, %192 : vector<8x1xi32>
    %194 = vector.shape_cast %193 : vector<8x1xi32> to vector<8x1xi32>
    %195 = vector.broadcast %194 : vector<8x1xi32> to vector<8x4xi32>
    %196 = arith.select %191, %195, %171 : vector<8x4xi1>, vector<8x4xi32>
    %197 = vector.broadcast %184 : vector<8x1xi32> to vector<8x256xi32>
    %198 = arith.cmpi eq, %175, %197 : vector<8x256xi32>
    %c2147483647_i32_50 = arith.constant 2147483647 : i32
    %199 = vector.broadcast %c2147483647_i32_50 : i32 to vector<8x256xi32>
    %200 = arith.select %198, %199, %175 : vector<8x256xi1>, vector<8x256xi32>
    %201 = vector.broadcast %184 : vector<8x1xi32> to vector<8x8xi32>
    %202 = arith.cmpi eq, %179, %201 : vector<8x8xi32>
    %c2147483647_i32_51 = arith.constant 2147483647 : i32
    %203 = vector.broadcast %c2147483647_i32_51 : i32 to vector<8x8xi32>
    %204 = arith.select %202, %203, %179 : vector<8x8xi1>, vector<8x8xi32>
    %cst_52 = arith.constant dense<2147483647> : vector<8xi32>
    %205 = vector.multi_reduction <minsi>, %200, %cst_52 [1] : vector<8x256xi32> to vector<8xi32>
    %206 = vector.shape_cast %205 : vector<8xi32> to vector<8x1xi32>
    %cst_53 = arith.constant dense<2147483647> : vector<8xi32>
    %207 = vector.multi_reduction <minsi>, %204, %cst_53 [1] : vector<8x8xi32> to vector<8xi32>
    %208 = vector.shape_cast %207 : vector<8xi32> to vector<8x1xi32>
    %209 = arith.minsi %206, %208 : vector<8x1xi32>
    %c7_i32 = arith.constant 7 : i32
    %210 = vector.broadcast %c7_i32 : i32 to vector<8x8xi32>
    %211 = arith.cmpi eq, %26, %210 : vector<8x8xi32>
    %212 = vector.shape_cast %209 : vector<8x1xi32> to vector<8x1xi32>
    %213 = vector.broadcast %212 : vector<8x1xi32> to vector<8x8xi32>
    %214 = arith.select %211, %213, %189 : vector<8x8xi1>, vector<8x8xi32>
    %c7_i32_54 = arith.constant 7 : i32
    %215 = vector.broadcast %c7_i32_54 : i32 to vector<8x4xi32>
    %216 = arith.cmpi eq, %28, %215 : vector<8x4xi32>
    %c255_i32_55 = arith.constant 255 : i32
    %217 = vector.broadcast %c255_i32_55 : i32 to vector<8x1xi32>
    %218 = arith.andi %209, %217 : vector<8x1xi32>
    %219 = vector.shape_cast %218 : vector<8x1xi32> to vector<8x1xi32>
    %220 = vector.broadcast %219 : vector<8x1xi32> to vector<8x4xi32>
    %221 = arith.select %216, %220, %196 : vector<8x4xi1>, vector<8x4xi32>
    %c0_56 = arith.constant 0 : index
    %c0_57 = arith.constant 0 : index
    %222 = vector.load %arg6[%c0_56, %c0_57] : memref<8x8xi32, #tpu.memory_space<vmem>>, vector<8x8xi32>
    tpu.vector_store %arg6[%c0_56, %c0_57], %214 {strides = array<i32>} : memref<8x8xi32, #tpu.memory_space<vmem>>, vector<8x8xi32>,
    %c0_i32_58 = arith.constant 0 : i32
    %223 = arith.cmpi eq, %arg1, %c0_i32_58 : i32
    %224 = arith.extui %223 : i1 to i32
    %c0_i32_59 = arith.constant 0 : i32
    %225 = arith.cmpi ne, %224, %c0_i32_59 : i32
    scf.if %225 {
      %c0_60 = arith.constant 0 : index
      %c0_61 = arith.constant 0 : index
      %226 = vector.load %arg5[%c0_60, %c0_61] : memref<8x4xi32, #tpu.memory_space<vmem>>, vector<8x4xi32>
      tpu.vector_store %arg5[%c0_60, %c0_61], %221 {strides = array<i32>} : memref<8x4xi32, #tpu.memory_space<vmem>>, vector<8x4xi32>,
    } else {
    }
    return
  }
  func.func @transform_0(%arg0: i32, %arg1: i32) -> (i32, i32) {
    %c0_i32 = arith.constant 0 : i32
    %c0_i32_0 = arith.constant 0 : i32
    return %arg0, %c0_i32 : i32, i32
  }
  func.func @transform_1(%arg0: i32, %arg1: i32) -> (i32, i32) {
    %c0_i32 = arith.constant 0 : i32
    %c0_i32_0 = arith.constant 0 : i32
    return %c0_i32, %arg1 : i32, i32
  }
  func.func @transform_2(%arg0: i32, %arg1: i32) -> (i32, i32) {
    %c0_i32 = arith.constant 0 : i32
    %c0_i32_0 = arith.constant 0 : i32
    return %arg0, %c0_i32 : i32, i32
  }
  func.func @transform_3(%arg0: i32, %arg1: i32) -> (i32, i32) {
    %c0_i32 = arith.constant 0 : i32
    %c0_i32_0 = arith.constant 0 : i32
    return %arg0, %c0_i32 : i32, i32
  }
}

</mosaic_0001>

<bundles_post_ra>
// kernel: tpu_custom_call.1
= control target key start
LH: loop header
LB: loop body
LE: loop exit
PB: predicated region body
PF: predicated region fallthrough
CT: control target
= control target key end

     0   :  { %s825_s12 = smov 0   ;;  %s827_s13 = smov 0   ;;  %s901_s0 = inlined_call_operand.vmem [shape: f32[16,2], index: 0, kind: input, shape index: {}]   ;;  %s902_s1 = inlined_call_operand.vmem [shape: f32[2,256], index: 1, kind: input, shape index: {}]   ;;  %s903_s2 = inlined_call_operand.vmem [shape: s32[16,4], index: 2, kind: input, shape index: {}]   ;;  %s904_s3 = inlined_call_operand.vmem [shape: s32[16,4], index: 3, kind: output, shape index: {}]  }
   0x1   :  { %s829_s14 = smov 0  }
   0x2 LB: > { %s25_s15 = sadd.s32 1, %s796_s13  ;;  %p743_p0 = scmp.ge.s32.totalorder %s800_s14, 1  ;;  %s800_s14 = sphi %s829_s14, %s13_s14   ;;  %s796_s13 = sphi %s827_s13, %s906_s13   ;;  %s792_s12 = sphi %s825_s12, %s905_s12  }
   0x3   : > { %p27_p1 = scmp.ge.s32.totalorder %s25_s15, 2  ;;  %p168_p2 = scmp.lt.s32.totalorder %s800_s14, 3 }
   0x5   : > { %s908_s15 = smov (%p27_p1, %s25_s15), 0  ;;  %p169_p3 = pnand %p743_p0, %p168_p2 }
   0x6   : > { %p199_p4 = scmp.lt.s32.totalorder (!%p169_p3), %s792_s12, 1 }
   0x7   : > { %172 = sbr.rel (%p169_p3) target bundleno = 2508 (0x9cc), region = 32 }
   0xc   : > { %v802_v0 = vmov 0   ;;  %s910_s12 = smov (!%p199_p4, %s792_s12), 1  ;;  %v803_v2 = vmov 1   ;;  %vm221_vm0 = vcmask 64512   ;;  %v804_v3 = vmov 2147483647  }
   0xd   : > { %776 = vset.pattern.permute.xlu0 %v802_v0  ;;  %s843_s16 = sshll.u32 %s910_s12, 3  ;;  %222 = vst.msk [vmem:[#allocation2] sm:$0xff] %vm221_vm0, %v804_v3  ;;  %v231_v4 = vlaneseq  ;;  %v224_v8 = vld [vmem:[%s902_s1] sm:$0xf] }
   0xe   : > { %s202_s19 = scalar_lea.vmem %s901_s0, %s843_s16  ;;  %s212_s24 = scalar_lea.vmem %s903_s2, %s843_s16 }
   0xf   : > { %v223_v1 = vld [vmem:[%s202_s19] sm:$0xff]  ;;  %v232_v5 = vshrl.u32 %v231_v4, 7  ;;  %v853_v23 = vand.u32 127, %v231_v4  ;;  %s216_s27 = scalar_lea.vmem %s904_s3, %s843_s16 }
  0x10   : > { %227 = vperm.xlu0 %776, %v223_v1   ;;  %v862_v60 = vld [vmem:[%s212_s24] sm:$0xff] }
  0x11   : > { %v233_v6 = vsub.s32 0, %v232_v5  ;;  %v237_v7 = vsub.s32 2, %v232_v5  ;;  %v257_v9 = vsub.s32 1, %v232_v5  ;;  %v261_v10 = vsub.s32 3, %v232_v5 }
  0x12   : > { %v283_v30 = vadd.s32 128, %v853_v23  ;;  %vm332_vm5 = vcmp.eq.s32.totalorder %v862_v60, 0  ;;  %vm330_vm12 = vcmp.eq.s32.totalorder %v853_v23, 0  ;;  %vm374_vm13 = vcmp.eq.s32.totalorder %v853_v23, 1 }
  0x13   : > { %v234_v11 = vrot.slane %v224_v8, %v233_v6  ;;  %v238_v12 = vrot.slane %v224_v8, %v237_v7  ;;  %v258_v13 = vrot.slane %v224_v8, %v257_v9  ;;  %v262_v14 = vrot.slane %v224_v8, %v261_v10 }
  0x14   : > { %777 = vset.pattern.permute.xlu0 %v803_v2  ;;  %v294_v35 = vld [vmem:[#allocation2] sm:$0xff]  ;;  %vm376_vm15 = vcmp.eq.s32.totalorder %v862_v60, 1 }
  0x15   : > { %252 = vperm.xlu0 %777, %v223_v1   ;;  %v244_v15 = vrot.slane %v234_v11, %v233_v6  ;;  %v248_v16 = vrot.slane %v238_v12, %v233_v6  ;;  %v268_v18 = vrot.slane %v258_v13, %v257_v9  ;;  %v272_v19 = vrot.slane %v262_v14, %v257_v9 }
  0x16   : > { %v313_v38 = vsel %vm221_vm0, %v294_v35, 2147483647 }
  0x17   : > { %v315_v41 = vshra.s32 %v313_v38, 16  ;;  %v314_v45 = vand.u32 65535, %v313_v38 }
  0x19   : > { %v317_v43 = vcvt.s32.f32 %v315_v41  ;;  %v316_v49 = vcvt.s32.f32 %v314_v45 }
  0x8b   : > { %v228_v17 = vpop.permute.xlu0 %227 }
  0x8c   : > { %v249_v20 = vsub.f32 %v228_v17, %v244_v15  ;;  %v250_v21 = vsub.f32 %v228_v17, %v248_v16 }
  0x8e   : > { %v275_v26 = vmul.f32 %v249_v20, %v249_v20  ;;  %v276_v27 = vmul.f32 %v250_v21, %v250_v21 }
  0x90   : > { %v253_v22 = vpop.permute.xlu0 %252 }
  0x91   : > { %v273_v24 = vsub.f32 %v253_v22, %v268_v18  ;;  %v274_v25 = vsub.f32 %v253_v22, %v272_v19 }
  0x93   : > { %v277_v28 = vmul.f32 %v273_v24, %v273_v24  ;;  %v278_v29 = vmul.f32 %v274_v25, %v274_v25 }
  0x95   : > { %v279_v31 = vadd.f32 %v277_v28, %v275_v26  ;;  %v280_v32 = vadd.f32 %v278_v29, %v276_v27 }
  0x97   : > { %v290_v33 = vand.u32 4294967040, %v279_v31  ;;  %v291_v34 = vand.u32 4294967040, %v280_v32 }
  0x99   : > { %v292_v36 = vor.u32 %v290_v33, %v853_v23  ;;  %v293_v37 = vor.u32 %v291_v34, %v283_v30 }
  0x9b   : > { %vm296_vm1 = vcmp.lt.s32.totalorder %v292_v36, %v293_v37 }
  0x9c   : > { %v297_v39 = vsel %vm296_vm1, %v292_v36, %v293_v37 }
  0x9d   : > { %v299_v40 = vshra.s32 %v297_v39, 16  ;;  %v298_v44 = vand.u32 65535, %v297_v39 }
  0x9f   : > { %v301_v42 = vcvt.s32.f32 %v299_v40  ;;  %v300_v47 = vcvt.s32.f32 %v298_v44 }
  0xa1   : > { %302 = vmin.xlane.f32.xlu1 %v301_v42 }
  0xa5   : > { %318 = vmin.xlane.f32.xlu1 %v317_v43 }
 0x12a   : > { %v303_v46 = vpop.xlane.xlu1 %302 }
 0x12b   : > { %vm304_vm2 = vcmp.eq.f32.partialorder %v301_v42, %v303_v46  ;;  %v309_v53 = vcvt.f32.s32 %v303_v46 }
 0x12c   : > { %v305_v48 = vsel %vm304_vm2, %v300_v47, inf }
 0x12d   : > { %306 = vmin.xlane.f32.xlu1 %v305_v48  ;;  %v310_v57 = vshll.u32 %v309_v53, 16 }
 0x12e   : > { %v319_v50 = vpop.xlane.xlu1 %318 }
 0x12f   : > { %vm320_vm3 = vcmp.eq.f32.partialorder %v317_v43, %v319_v50  ;;  %v325_v54 = vcvt.f32.s32 %v319_v50 }
 0x130   : > { %v321_v51 = vsel %vm320_vm3, %v316_v49, inf }
 0x131   : > { %322 = vmin.xlane.f32.xlu0 %v321_v51  ;;  %v326_v58 = vshll.u32 %v325_v54, 16 }
 0x1b6   : > { %v307_v52 = vpop.xlane.xlu1 %306 }
 0x1b7   : > { %v308_v55 = vcvt.f32.s32 %v307_v52 }
 0x1b9   : > { %v311_v61 = vadd.s32 %v310_v57, %v308_v55 }
 0x1ba   : > { %v323_v56 = vpop.xlane.xlu0 %322 }
 0x1bb   : > { %v324_v59 = vcvt.f32.s32 %v323_v56 }
 0x1bd   : > { %v327_v62 = vadd.s32 %v326_v58, %v324_v59 }
 0x1bf   : > { %vm328_vm4 = vcmp.lt.s32.totalorder %v311_v61, %v327_v62 }
 0x1c0   : > { %v329_v63 = vsel %vm328_vm4, %v311_v61, %v327_v62 }
 0x1c1   : > { %v333_v0 = vand.u32 255, %v329_v63  ;;  %vm335_vm6 = vcmp.eq.s32.totalorder %v292_v36, %v329_v63  ;;  %vm336_vm7 = vcmp.eq.s32.totalorder %v293_v37, %v329_v63  ;;  %vm339_vm8 = vcmp.eq.s32.totalorder %v294_v35, %v329_v63 }
 0x1c2   : > { %v337_v1 = vsel %vm335_vm6, 2147483647, %v292_v36  ;;  %v338_v2 = vsel %vm336_vm7, 2147483647, %v293_v37  ;;  %v340_v4 = vsel %vm339_vm8, 2147483647, %v294_v35 }
 0x1c3   : > { %v334_v3 = vsel %vm332_vm5, %v333_v0, 0  ;;  %vm341_vm9 = vcmp.lt.s32.totalorder %v337_v1, %v338_v2  ;;  %v357_v6 = vsel %vm221_vm0, %v340_v4, 2147483647  ;;  %v331_v30 = vsel %vm330_vm12, %v329_v63, 2147483647 }
 0x1c4   : > { %v342_v5 = vsel %vm341_vm9, %v337_v1, %v338_v2  ;;  %v359_v9 = vshra.s32 %v357_v6, 16  ;;  %v358_v14 = vand.u32 65535, %v357_v6  ;;  %vm418_vm7 = vcmp.eq.s32.totalorder %v853_v23, 2 }
 0x1c5   : > { %v344_v7 = vshra.s32 %v342_v5, 16  ;;  %v343_v11 = vand.u32 65535, %v342_v5  ;;  %vm420_vm9 = vcmp.eq.s32.totalorder %v862_v60, 2 }
 0x1c6   : > { %v361_v10 = vcvt.s32.f32 %v359_v9  ;;  %v360_v17 = vcvt.s32.f32 %v358_v14 }
 0x1c7   : > { %v346_v8 = vcvt.s32.f32 %v344_v7  ;;  %v345_v13 = vcvt.s32.f32 %v343_v11 }
 0x1c9   : > { %347 = vmin.xlane.f32.xlu1 %v346_v8 }
 0x1cd   : > { %362 = vmin.xlane.f32.xlu1 %v361_v10 }
 0x252   : > { %v348_v12 = vpop.xlane.xlu1 %347 }
 0x253   : > { %vm349_vm10 = vcmp.eq.f32.partialorder %v346_v8, %v348_v12  ;;  %v354_v20 = vcvt.f32.s32 %v348_v12 }
 0x254   : > { %v350_v15 = vsel %vm349_vm10, %v345_v13, inf }
 0x255   : > { %351 = vmin.xlane.f32.xlu1 %v350_v15  ;;  %v355_v25 = vshll.u32 %v354_v20, 16 }
 0x256   : > { %v363_v16 = vpop.xlane.xlu1 %362 }
 0x257   : > { %vm364_vm11 = vcmp.eq.f32.partialorder %v361_v10, %v363_v16  ;;  %v369_v21 = vcvt.f32.s32 %v363_v16 }
 0x258   : > { %v365_v18 = vsel %vm364_vm11, %v360_v17, inf }
 0x259   : > { %366 = vmin.xlane.f32.xlu1 %v365_v18  ;;  %v370_v26 = vshll.u32 %v369_v21, 16 }
 0x2de   : > { %v352_v19 = vpop.xlane.xlu1 %351 }
 0x2df   : > { %v353_v22 = vcvt.f32.s32 %v352_v19 }
 0x2e1   : > { %v356_v28 = vadd.s32 %v355_v25, %v353_v22 }
 0x2e2   : > { %v367_v24 = vpop.xlane.xlu1 %366 }
 0x2e3   : > { %v368_v27 = vcvt.f32.s32 %v367_v24 }
 0x2e5   : > { %v371_v29 = vadd.s32 %v370_v26, %v368_v27 }
 0x2e7   : > { %vm372_vm14 = vcmp.lt.s32.totalorder %v356_v28, %v371_v29 }
 0x2e8   : > { %v373_v31 = vsel %vm372_vm14, %v356_v28, %v371_v29 }
 0x2e9   : > { %v375_v32 = vsel %vm374_vm13, %v373_v31, %v331_v30  ;;  %v377_v33 = vand.u32 255, %v373_v31  ;;  %vm379_vm1 = vcmp.eq.s32.totalorder %v337_v1, %v373_v31  ;;  %vm380_vm2 = vcmp.eq.s32.totalorder %v338_v2, %v373_v31 }
 0x2ea   : > { %v381_v34 = vsel %vm379_vm1, 2147483647, %v337_v1  ;;  %v382_v35 = vsel %vm380_vm2, 2147483647, %v338_v2  ;;  %vm383_vm3 = vcmp.eq.s32.totalorder %v340_v4, %v373_v31  ;;  %vm462_vm1 = vcmp.eq.s32.totalorder %v853_v23, 3 }
 0x2eb   : > { %v378_v36 = vsel %vm376_vm15, %v377_v33, %v334_v3  ;;  %vm385_vm4 = vcmp.lt.s32.totalorder %v381_v34, %v382_v35  ;;  %v384_v37 = vsel %vm383_vm3, 2147483647, %v340_v4  ;;  %vm464_vm3 = vcmp.eq.s32.totalorder %v862_v60, 3 }
 0x2ec   : > { %v386_v38 = vsel %vm385_vm4, %v381_v34, %v382_v35  ;;  %v401_v39 = vsel %vm221_vm0, %v384_v37, 2147483647 }
 0x2ed   : > { %v388_v40 = vshra.s32 %v386_v38, 16  ;;  %v403_v42 = vshra.s32 %v401_v39, 16  ;;  %v387_v44 = vand.u32 65535, %v386_v38  ;;  %v402_v47 = vand.u32 65535, %v401_v39 }
 0x2ef   : > { %v390_v41 = vcvt.s32.f32 %v388_v40  ;;  %v405_v43 = vcvt.s32.f32 %v403_v42  ;;  %v389_v46 = vcvt.s32.f32 %v387_v44  ;;  %v404_v50 = vcvt.s32.f32 %v402_v47 }
 0x2f1   : > { %391 = vmin.xlane.f32.xlu1 %v390_v41 }
 0x2f5   : > { %406 = vmin.xlane.f32.xlu1 %v405_v43 }
 0x37a   : > { %v392_v45 = vpop.xlane.xlu1 %391 }
 0x37b   : > { %vm393_vm5 = vcmp.eq.f32.partialorder %v390_v41, %v392_v45  ;;  %v398_v53 = vcvt.f32.s32 %v392_v45 }
 0x37c   : > { %v394_v48 = vsel %vm393_vm5, %v389_v46, inf }
 0x37d   : > { %395 = vmin.xlane.f32.xlu1 %v394_v48  ;;  %v399_v57 = vshll.u32 %v398_v53, 16 }
 0x37e   : > { %v407_v49 = vpop.xlane.xlu1 %406 }
 0x37f   : > { %vm408_vm6 = vcmp.eq.f32.partialorder %v405_v43, %v407_v49  ;;  %v413_v54 = vcvt.f32.s32 %v407_v49 }
 0x380   : > { %v409_v51 = vsel %vm408_vm6, %v404_v50, inf }
 0x381   : > { %410 = vmin.xlane.f32.xlu1 %v409_v51  ;;  %v414_v58 = vshll.u32 %v413_v54, 16 }
 0x406   : > { %v396_v52 = vpop.xlane.xlu1 %395 }
 0x407   : > { %v397_v55 = vcvt.f32.s32 %v396_v52 }
 0x409   : > { %v400_v61 = vadd.s32 %v399_v57, %v397_v55 }
 0x40a   : > { %v411_v56 = vpop.xlane.xlu1 %410 }
 0x40b   : > { %v412_v59 = vcvt.f32.s32 %v411_v56 }
 0x40d   : > { %v415_v62 = vadd.s32 %v414_v58, %v412_v59 }
 0x40f   : > { %vm416_vm8 = vcmp.lt.s32.totalorder %v400_v61, %v415_v62 }
 0x410   : > { %v417_v63 = vsel %vm416_vm8, %v400_v61, %v415_v62 }
 0x411   : > { %v419_v0 = vsel %vm418_vm7, %v417_v63, %v375_v32  ;;  %v421_v1 = vand.u32 255, %v417_v63  ;;  %vm427_vm10 = vcmp.eq.s32.totalorder %v384_v37, %v417_v63  ;;  %vm423_vm11 = vcmp.eq.s32.totalorder %v381_v34, %v417_v63 }
 0x412   : > { %v428_v2 = vsel %vm427_vm10, 2147483647, %v384_v37  ;;  %vm424_vm12 = vcmp.eq.s32.totalorder %v382_v35, %v417_v63  ;;  %v425_v3 = vsel %vm423_vm11, 2147483647, %v381_v34  ;;  %vm506_vm10 = vcmp.eq.s32.totalorder %v853_v23, 4 }
 0x413   : > { %v422_v4 = vsel %vm420_vm9, %v421_v1, %v378_v36  ;;  %v445_v5 = vsel %vm221_vm0, %v428_v2, 2147483647  ;;  %v426_v6 = vsel %vm424_vm12, 2147483647, %v382_v35  ;;  %vm508_vm12 = vcmp.eq.s32.totalorder %v862_v60, 4 }
 0x414   : > { %v447_v7 = vshra.s32 %v445_v5, 16  ;;  %vm429_vm13 = vcmp.lt.s32.totalorder %v425_v3, %v426_v6  ;;  %v446_v12 = vand.u32 65535, %v445_v5 }
 0x415   : > { %v430_v8 = vsel %vm429_vm13, %v425_v3, %v426_v6 }
 0x416   : > { %v449_v9 = vcvt.s32.f32 %v447_v7  ;;  %v432_v10 = vshra.s32 %v430_v8, 16  ;;  %v431_v13 = vand.u32 65535, %v430_v8  ;;  %v448_v15 = vcvt.s32.f32 %v446_v12 }
 0x418   : > { %450 = vmin.xlane.f32.xlu1 %v449_v9  ;;  %v434_v11 = vcvt.s32.f32 %v432_v10  ;;  %v433_v18 = vcvt.s32.f32 %v431_v13 }
 0x41a   : > { %435 = vmin.xlane.f32.xlu0 %v434_v11 }
 0x4a1   : > { %v451_v14 = vpop.xlane.xlu1 %450 }
 0x4a2   : > { %vm452_vm14 = vcmp.eq.f32.partialorder %v449_v9, %v451_v14  ;;  %v457_v20 = vcvt.f32.s32 %v451_v14 }
 0x4a3   : > { %v436_v16 = vpop.xlane.xlu0 %435  ;;  %v453_v17 = vsel %vm452_vm14, %v448_v15, inf }
 0x4a4   : > { %454 = vmin.xlane.f32.xlu1 %v453_v17  ;;  %vm437_vm15 = vcmp.eq.f32.partialorder %v434_v11, %v436_v16  ;;  %v442_v21 = vcvt.f32.s32 %v436_v16  ;;  %v458_v24 = vshll.u32 %v457_v20, 16 }
 0x4a5   : > { %v438_v19 = vsel %vm437_vm15, %v433_v18, inf }
 0x4a6   : > { %439 = vmin.xlane.f32.xlu0 %v438_v19  ;;  %v443_v27 = vshll.u32 %v442_v21, 16 }
 0x52d   : > { %v455_v22 = vpop.xlane.xlu1 %454 }
 0x52e   : > { %v456_v25 = vcvt.f32.s32 %v455_v22 }
 0x52f   : > { %v440_v26 = vpop.xlane.xlu0 %439 }
 0x530   : > { %v459_v28 = vadd.s32 %v458_v24, %v456_v25  ;;  %v441_v29 = vcvt.f32.s32 %v440_v26 }
 0x532   : > { %v444_v30 = vadd.s32 %v443_v27, %v441_v29 }
 0x534   : > { %vm460_vm2 = vcmp.lt.s32.totalorder %v444_v30, %v459_v28 }
 0x535   : > { %v461_v31 = vsel %vm460_vm2, %v444_v30, %v459_v28 }
 0x536   : > { %v463_v32 = vsel %vm462_vm1, %v461_v31, %v419_v0  ;;  %v465_v33 = vand.u32 255, %v461_v31  ;;  %vm471_vm4 = vcmp.eq.s32.totalorder %v428_v2, %v461_v31  ;;  %vm467_vm5 = vcmp.eq.s32.totalorder %v425_v3, %v461_v31 }
 0x537   : > { %v472_v34 = vsel %vm471_vm4, 2147483647, %v428_v2  ;;  %vm468_vm6 = vcmp.eq.s32.totalorder %v426_v6, %v461_v31  ;;  %v469_v35 = vsel %vm467_vm5, 2147483647, %v425_v3  ;;  %vm550_vm5 = vcmp.eq.s32.totalorder %v853_v23, 5 }
 0x538   : > { %v466_v36 = vsel %vm464_vm3, %v465_v33, %v422_v4  ;;  %v489_v37 = vsel %vm221_vm0, %v472_v34, 2147483647  ;;  %v470_v38 = vsel %vm468_vm6, 2147483647, %v426_v6  ;;  %vm552_vm6 = vcmp.eq.s32.totalorder %v862_v60, 5 }
 0x539   : > { %v491_v39 = vshra.s32 %v489_v37, 16  ;;  %vm473_vm7 = vcmp.lt.s32.totalorder %v469_v35, %v470_v38  ;;  %v490_v44 = vand.u32 65535, %v489_v37 }
 0x53a   : > { %v474_v40 = vsel %vm473_vm7, %v469_v35, %v470_v38 }
 0x53b   : > { %v493_v41 = vcvt.s32.f32 %v491_v39  ;;  %v476_v42 = vshra.s32 %v474_v40, 16  ;;  %v475_v45 = vand.u32 65535, %v474_v40  ;;  %v492_v47 = vcvt.s32.f32 %v490_v44 }
 0x53d   : > { %494 = vmin.xlane.f32.xlu1 %v493_v41  ;;  %v478_v43 = vcvt.s32.f32 %v476_v42  ;;  %v477_v50 = vcvt.s32.f32 %v475_v45 }
 0x53f   : > { %479 = vmin.xlane.f32.xlu0 %v478_v43 }
 0x5c6   : > { %v495_v46 = vpop.xlane.xlu1 %494 }
 0x5c7   : > { %vm496_vm8 = vcmp.eq.f32.partialorder %v493_v41, %v495_v46  ;;  %v501_v52 = vcvt.f32.s32 %v495_v46 }
 0x5c8   : > { %v480_v48 = vpop.xlane.xlu0 %479  ;;  %v497_v49 = vsel %vm496_vm8, %v492_v47, inf }
 0x5c9   : > { %498 = vmin.xlane.f32.xlu1 %v497_v49  ;;  %vm481_vm9 = vcmp.eq.f32.partialorder %v478_v43, %v480_v48  ;;  %v486_v53 = vcvt.f32.s32 %v480_v48  ;;  %v502_v55 = vshll.u32 %v501_v52, 16 }
 0x5ca   : > { %v482_v51 = vsel %vm481_vm9, %v477_v50, inf }
 0x5cb   : > { %483 = vmin.xlane.f32.xlu0 %v482_v51  ;;  %v487_v58 = vshll.u32 %v486_v53, 16 }
 0x652   : > { %v499_v54 = vpop.xlane.xlu1 %498 }
 0x653   : > { %v500_v56 = vcvt.f32.s32 %v499_v54 }
 0x654   : > { %v484_v57 = vpop.xlane.xlu0 %483 }
 0x655   : > { %v503_v59 = vadd.s32 %v502_v55, %v500_v56  ;;  %v485_v61 = vcvt.f32.s32 %v484_v57 }
 0x657   : > { %v488_v62 = vadd.s32 %v487_v58, %v485_v61 }
 0x659   : > { %vm504_vm11 = vcmp.lt.s32.totalorder %v488_v62, %v503_v59 }
 0x65a   : > { %v505_v63 = vsel %vm504_vm11, %v488_v62, %v503_v59 }
 0x65b   : > { %v507_v0 = vsel %vm506_vm10, %v505_v63, %v463_v32  ;;  %v509_v1 = vand.u32 255, %v505_v63  ;;  %vm515_vm13 = vcmp.eq.s32.totalorder %v472_v34, %v505_v63  ;;  %vm511_vm14 = vcmp.eq.s32.totalorder %v469_v35, %v505_v63 }
 0x65c   : > { %v516_v2 = vsel %vm515_vm13, 2147483647, %v472_v34  ;;  %vm512_vm15 = vcmp.eq.s32.totalorder %v470_v38, %v505_v63  ;;  %v513_v3 = vsel %vm511_vm14, 2147483647, %v469_v35  ;;  %vm594_vm14 = vcmp.eq.s32.totalorder %v853_v23, 6 }
 0x65d   : > { %v510_v4 = vsel %vm508_vm12, %v509_v1, %v466_v36  ;;  %v533_v5 = vsel %vm221_vm0, %v516_v2, 2147483647  ;;  %v514_v6 = vsel %vm512_vm15, 2147483647, %v470_v38  ;;  %vm596_vm15 = vcmp.eq.s32.totalorder %v862_v60, 6 }
 0x65e   : > { %v535_v7 = vshra.s32 %v533_v5, 16  ;;  %vm517_vm1 = vcmp.lt.s32.totalorder %v513_v3, %v514_v6  ;;  %v534_v12 = vand.u32 65535, %v533_v5 }
 0x65f   : > { %v518_v8 = vsel %vm517_vm1, %v513_v3, %v514_v6 }
 0x660   : > { %v537_v9 = vcvt.s32.f32 %v535_v7  ;;  %v520_v10 = vshra.s32 %v518_v8, 16  ;;  %v519_v13 = vand.u32 65535, %v518_v8  ;;  %v536_v15 = vcvt.s32.f32 %v534_v12 }
 0x662   : > { %538 = vmin.xlane.f32.xlu1 %v537_v9  ;;  %v522_v11 = vcvt.s32.f32 %v520_v10  ;;  %v521_v18 = vcvt.s32.f32 %v519_v13 }
 0x664   : > { %523 = vmin.xlane.f32.xlu0 %v522_v11 }
 0x6eb   : > { %v539_v14 = vpop.xlane.xlu1 %538 }
 0x6ec   : > { %vm540_vm2 = vcmp.eq.f32.partialorder %v537_v9, %v539_v14  ;;  %v545_v20 = vcvt.f32.s32 %v539_v14 }
 0x6ed   : > { %v524_v16 = vpop.xlane.xlu0 %523  ;;  %v541_v17 = vsel %vm540_vm2, %v536_v15, inf }
 0x6ee   : > { %542 = vmin.xlane.f32.xlu1 %v541_v17  ;;  %vm525_vm3 = vcmp.eq.f32.partialorder %v522_v11, %v524_v16  ;;  %v530_v21 = vcvt.f32.s32 %v524_v16  ;;  %v546_v24 = vshll.u32 %v545_v20, 16 }
 0x6ef   : > { %v526_v19 = vsel %vm525_vm3, %v521_v18, inf }
 0x6f0   : > { %527 = vmin.xlane.f32.xlu0 %v526_v19  ;;  %v531_v27 = vshll.u32 %v530_v21, 16 }
 0x777   : > { %v543_v22 = vpop.xlane.xlu1 %542 }
 0x778   : > { %v544_v25 = vcvt.f32.s32 %v543_v22 }
 0x779   : > { %v528_v26 = vpop.xlane.xlu0 %527 }
 0x77a   : > { %v547_v28 = vadd.s32 %v546_v24, %v544_v25  ;;  %v529_v29 = vcvt.f32.s32 %v528_v26 }
 0x77c   : > { %v532_v30 = vadd.s32 %v531_v27, %v529_v29 }
 0x77e   : > { %vm548_vm4 = vcmp.lt.s32.totalorder %v532_v30, %v547_v28 }
 0x77f   : > { %v549_v31 = vsel %vm548_vm4, %v532_v30, %v547_v28 }
 0x780   : > { %v553_v32 = vand.u32 255, %v549_v31  ;;  %vm559_vm7 = vcmp.eq.s32.totalorder %v516_v2, %v549_v31  ;;  %vm555_vm8 = vcmp.eq.s32.totalorder %v513_v3, %v549_v31  ;;  %vm556_vm9 = vcmp.eq.s32.totalorder %v514_v6, %v549_v31 }
 0x781   : > { %v560_v33 = vsel %vm559_vm7, 2147483647, %v516_v2  ;;  %v557_v34 = vsel %vm555_vm8, 2147483647, %v513_v3  ;;  %v558_v35 = vsel %vm556_vm9, 2147483647, %v514_v6  ;;  %v551_v36 = vsel %vm550_vm5, %v549_v31, %v507_v0 }
 0x782   : > { %v577_v37 = vsel %vm221_vm0, %v560_v33, 2147483647  ;;  %vm561_vm10 = vcmp.lt.s32.totalorder %v557_v34, %v558_v35  ;;  %v554_v38 = vsel %vm552_vm6, %v553_v32, %v510_v4  ;;  %vm638_vm7 = vcmp.eq.s32.totalorder %v853_v23, 7 }
 0x783   : > { %v579_v39 = vshra.s32 %v577_v37, 16  ;;  %v562_v40 = vsel %vm561_vm10, %v557_v34, %v558_v35  ;;  %v578_v44 = vand.u32 65535, %v577_v37  ;;  %vm640_vm9 = vcmp.eq.s32.totalorder %v862_v60, 7 }
 0x784   : > { %v564_v41 = vshra.s32 %v562_v40, 16  ;;  %v563_v45 = vand.u32 65535, %v562_v40  ;;  %vm647_vm10 = vcmask 31744  }
 0x785   : > { %v581_v42 = vcvt.s32.f32 %v579_v39  ;;  %v580_v47 = vcvt.s32.f32 %v578_v44 }
 0x786   : > { %v566_v43 = vcvt.s32.f32 %v564_v41  ;;  %v565_v49 = vcvt.s32.f32 %v563_v45 }
 0x787   : > { %582 = vmin.xlane.f32.xlu1 %v581_v42 }
 0x788   : > { %567 = vmin.xlane.f32.xlu0 %v566_v43 }
 0x810   : > { %v583_v46 = vpop.xlane.xlu1 %582 }
 0x811   : > { %v568_v48 = vpop.xlane.xlu0 %567  ;;  %vm584_vm11 = vcmp.eq.f32.partialorder %v581_v42, %v583_v46  ;;  %v589_v52 = vcvt.f32.s32 %v583_v46 }
 0x812   : > { %v585_v50 = vsel %vm584_vm11, %v580_v47, inf  ;;  %vm569_vm12 = vcmp.eq.f32.partialorder %v566_v43, %v568_v48  ;;  %v574_v53 = vcvt.f32.s32 %v568_v48 }
 0x813   : > { %586 = vmin.xlane.f32.xlu1 %v585_v50  ;;  %v570_v51 = vsel %vm569_vm12, %v565_v49, inf  ;;  %v590_v55 = vshll.u32 %v589_v52, 16 }
 0x814   : > { %571 = vmin.xlane.f32.xlu0 %v570_v51  ;;  %v575_v58 = vshll.u32 %v574_v53, 16 }
 0x89c   : > { %v587_v54 = vpop.xlane.xlu1 %586 }
 0x89d   : > { %v588_v56 = vcvt.f32.s32 %v587_v54  ;;  %v572_v57 = vpop.xlane.xlu0 %571 }
 0x89e   : > { %v573_v59 = vcvt.f32.s32 %v572_v57 }
 0x89f   : > { %v591_v61 = vadd.s32 %v590_v55, %v588_v56 }
 0x8a0   : > { %v576_v62 = vadd.s32 %v575_v58, %v573_v59 }
 0x8a2   : > { %vm592_vm13 = vcmp.lt.s32.totalorder %v576_v62, %v591_v61 }
 0x8a3   : > { %v593_v63 = vsel %vm592_vm13, %v576_v62, %v591_v61 }
 0x8a4   : > { %v597_v0 = vand.u32 255, %v593_v63  ;;  %vm603_vm1 = vcmp.eq.s32.totalorder %v560_v33, %v593_v63  ;;  %vm599_vm2 = vcmp.eq.s32.totalorder %v557_v34, %v593_v63  ;;  %vm600_vm3 = vcmp.eq.s32.totalorder %v558_v35, %v593_v63 }
 0x8a5   : > { %v604_v1 = vsel %vm603_vm1, 2147483647, %v560_v33  ;;  %v601_v2 = vsel %vm599_vm2, 2147483647, %v557_v34  ;;  %v602_v3 = vsel %vm600_vm3, 2147483647, %v558_v35  ;;  %v595_v4 = vsel %vm594_vm14, %v593_v63, %v551_v36 }
 0x8a6   : > { %v621_v5 = vsel %vm221_vm0, %v604_v1, 2147483647  ;;  %vm605_vm4 = vcmp.lt.s32.totalorder %v601_v2, %v602_v3  ;;  %v598_v6 = vsel %vm596_vm15, %v597_v0, %v554_v38 }
 0x8a7   : > { %v623_v7 = vshra.s32 %v621_v5, 16  ;;  %v606_v8 = vsel %vm605_vm4, %v601_v2, %v602_v3  ;;  %v622_v12 = vand.u32 65535, %v621_v5 }
 0x8a8   : > { %v608_v9 = vshra.s32 %v606_v8, 16  ;;  %v607_v13 = vand.u32 65535, %v606_v8 }
 0x8a9   : > { %v625_v10 = vcvt.s32.f32 %v623_v7  ;;  %v624_v15 = vcvt.s32.f32 %v622_v12 }
 0x8aa   : > { %v610_v11 = vcvt.s32.f32 %v608_v9  ;;  %v609_v17 = vcvt.s32.f32 %v607_v13 }
 0x8ab   : > { %626 = vmin.xlane.f32.xlu1 %v625_v10 }
 0x8ac   : > { %611 = vmin.xlane.f32.xlu0 %v610_v11 }
 0x934   : > { %v627_v14 = vpop.xlane.xlu1 %626 }
 0x935   : > { %v612_v16 = vpop.xlane.xlu0 %611  ;;  %vm628_vm5 = vcmp.eq.f32.partialorder %v625_v10, %v627_v14  ;;  %v633_v20 = vcvt.f32.s32 %v627_v14 }
 0x936   : > { %v629_v18 = vsel %vm628_vm5, %v624_v15, inf  ;;  %vm613_vm6 = vcmp.eq.f32.partialorder %v610_v11, %v612_v16  ;;  %v618_v21 = vcvt.f32.s32 %v612_v16 }
 0x937   : > { %630 = vmin.xlane.f32.xlu1 %v629_v18  ;;  %v614_v19 = vsel %vm613_vm6, %v609_v17, inf  ;;  %v634_v24 = vshll.u32 %v633_v20, 16 }
 0x938   : > { %615 = vmin.xlane.f32.xlu0 %v614_v19  ;;  %v619_v27 = vshll.u32 %v618_v21, 16 }
 0x9c0   : > { %v631_v22 = vpop.xlane.xlu1 %630 }
 0x9c1   : > { %v632_v25 = vcvt.f32.s32 %v631_v22  ;;  %v616_v26 = vpop.xlane.xlu0 %615 }
 0x9c2   : > { %v617_v28 = vcvt.f32.s32 %v616_v26 }
 0x9c3   : > { %v635_v29 = vadd.s32 %v634_v24, %v632_v25 }
 0x9c4   : > { %v620_v30 = vadd.s32 %v619_v27, %v617_v28 }
 0x9c6   : > { %vm636_vm8 = vcmp.lt.s32.totalorder %v620_v30, %v635_v29 }
 0x9c7   : > { %v637_v31 = vsel %vm636_vm8, %v620_v30, %v635_v29 }
 0x9c8   : > { %v639_v32 = vsel %vm638_vm7, %v637_v31, %v595_v4  ;;  %v641_v33 = vand.u32 255, %v637_v31 }
 0x9c9   : > { %643 = vst.msk [vmem:[#allocation2] sm:$0xff] %vm221_vm0, %v639_v32 }
 0x9ca   : > { %v642_v34 = vsel %vm640_vm9, %v641_v33, %v598_v6 }
 0x9cb   : > { %648 = vst.msk [vmem:[%s216_s27] sm:$0xff] %vm647_vm10, %v642_v34 }
 0x9cc PF: > { %s13_s14 = sadd.s32 1, %s800_s14   ;;  %s905_s12 = smov %s796_s13 }
 0x9cd   : > { %p10_p5 = scmp.ge.s32.totalorder %s13_s14, 4   ;;  %s906_s13 = smov %s908_s15 }
 0x9cf   :  { %12 = sbr.rel (!%p10_p5) target bundleno = 2 (0x2), region = 76 }

</bundles_post_ra>
